<compile_context>
chip_gen: v5e
topology: v5e:2x2
jax: 0.10.0
libtpu: 0.0.40
codegen_flags: <defaults>
</compile_context>

<pallas_src>
import functools

import jax
import jax.numpy as jnp
from jax.experimental import pallas as pl
from jax.experimental.pallas import tpu as pltpu


def _round_up(x, m):
    return ((x + m - 1) // m) * m


def _cdiv(a, b):
    return (a + b - 1) // b


def policy_mlp_kernel(x_ref, w1_ref, b1_ref, w2_ref, b2_ref, out_ref):
    # x:  [TB, Fp] f32  (streamed from HBM; bf16 cast done here so the wrapper
    #                    never materializes a padded/casted copy of the input)
    # w1: [Fp, Hp] bf16   b1: [1, Hp] f32
    # w2: [Hp, Ap] bf16   b2: [1, Ap] f32   out: [TB, Ap] bf16
    x = x_ref[...].astype(jnp.bfloat16)
    # MXU matmuls with f32 accumulation; bias add + ReLU on the f32 accumulator.
    h = jnp.dot(x, w1_ref[...], preferred_element_type=jnp.float32) + b1_ref[...]
    h = jnp.maximum(h, 0.0).astype(jnp.bfloat16)
    logits = jnp.dot(h, w2_ref[...], preferred_element_type=jnp.float32) + b2_ref[...]
    out_ref[...] = logits.astype(out_ref.dtype)  # bf16 store (halves output HBM write)


def _vmem_limits():
    """(vmem_limit_bytes, tile_budget_bytes), sized per chip generation.

    v7x   : 64 MiB physical -> limit 40 MiB, budget 30 MiB.
    v5e/v6e: 128 MiB physical -> limit 64 MiB, budget 48 MiB.
    Unknown / query failure -> assume the smallest (v7x-safe) numbers.
    """
    try:
        phys = int(pltpu.get_tpu_info().vmem_capacity_bytes)
    except Exception:
        phys = 64 << 20
    limit = min(64 << 20, (phys * 5) // 8)
    return limit, (limit * 3) // 4


def _pick_tile_b(b_pad, f_pad, h_pad, a_pad, *, max_tile_b, vmem_budget_bytes):
    """Largest batch tile (multiple of 8, <= max_tile_b) whose 2-deep streaming
    tiles (f32 x in, bf16 logits out) plus the DOUBLE-buffered resident weights
    fit the VMEM budget."""
    resident = 2 * (f_pad * h_pad * 2 + h_pad * a_pad * 2 + (h_pad + a_pad) * 4)
    tb = max(_round_up(min(max_tile_b, b_pad), 8), 8)
    while tb > 8:
        streaming = 2 * tb * (f_pad * 4 + a_pad * 2)   # x (f32) + out (bf16), 2-deep
        if resident + streaming <= vmem_budget_bytes:
            break
        tb = max(_round_up(tb // 2, 8), 8)
    return tb


def prepare_params(w1, b1, w2, b2):
    """Pad/cast parameters ONCE at init (hoisted out of the per-call path)."""
    F, Hd = w1.shape
    A = w2.shape[1]
    F_pad = _round_up(F, 128)
    H_pad = _round_up(Hd, 128)
    A_pad = _round_up(A, 128)
    w1_p = jnp.zeros((F_pad, H_pad), jnp.bfloat16).at[:F, :Hd].set(w1.astype(jnp.bfloat16))
    b1_p = jnp.zeros((1, H_pad), jnp.float32).at[:, :Hd].set(b1.reshape(1, Hd))
    w2_p = jnp.zeros((H_pad, A_pad), jnp.bfloat16).at[:Hd, :A].set(w2.astype(jnp.bfloat16))
    b2_p = jnp.zeros((1, A_pad), jnp.float32).at[:, :A].set(b2.reshape(1, A))
    return w1_p, b1_p, w2_p, b2_p


@functools.partial(jax.jit, static_argnames=("out_actions", "max_tile_b"))
def policy_forward(obs_nchw, w1_p, b1_p, w2_p, b2_p, *, out_actions, max_tile_b=2048):
    """obs [B, C, H, W] f32 -> logits [B, out_actions] f32."""
    B = obs_nchw.shape[0]
    x = obs_nchw.reshape(B, -1).astype(jnp.float32)   # same flattening as torch .view(B, -1)
    F = x.shape[1]
    F_pad, H_pad = w1_p.shape
    A_pad = w2_p.shape[1]

    vmem_limit, vmem_budget = _vmem_limits()

    # Batch tiling: largest VMEM-feasible tile; for large batches force >= 2
    # grid steps so both v7x TensorCores get work under "parallel" semantics.
    B8 = _round_up(B, 8)
    tb_cap = _pick_tile_b(B8, F_pad, H_pad, A_pad,
                          max_tile_b=max_tile_b, vmem_budget_bytes=vmem_budget)
    n_steps = max(_cdiv(B8, tb_cap), 2 if B8 >= 512 else 1)
    # Multi-step tiles rounded to 16 sublanes (bf16-output friendly); a single
    # step uses the full (8-aligned) array so the block equals the array dims.
    tb = _round_up(_cdiv(B8, n_steps), 8 if n_steps == 1 else 16)
    B_pad = n_steps * tb

    # Fast path: stream f32 observations directly (no wrapper materialization).
    if (B_pad, F_pad) != (B, F):
        x_in = jnp.pad(x, ((0, B_pad - B), (0, F_pad - F)))
    else:
        x_in = x

    flops = 2 * B_pad * F_pad * H_pad + 2 * B_pad * H_pad * A_pad
    bytes_accessed = (B_pad * F_pad * 4 + w1_p.size * 2 + w2_p.size * 2
                      + b1_p.size * 4 + b2_p.size * 4 + B_pad * A_pad * 2)

    out_padded = pl.pallas_call(
        policy_mlp_kernel,
        out_shape=jax.ShapeDtypeStruct((B_pad, A_pad), jnp.bfloat16),
        grid_spec=pltpu.PrefetchScalarGridSpec(
            num_scalar_prefetch=0,
            grid=(n_steps,),
            in_specs=[
                # Only x streams over the batch grid.
                pl.BlockSpec((tb, F_pad), lambda i: (i, 0)),
                # Weights/biases: constant index_map -> one DMA, VMEM-resident
                # across all grid steps (counted x2 in the tile budget).
                pl.BlockSpec((F_pad, H_pad), lambda i: (0, 0)),
                pl.BlockSpec((1, H_pad), lambda i: (0, 0)),
                pl.BlockSpec((H_pad, A_pad), lambda i: (0, 0)),
                pl.BlockSpec((1, A_pad), lambda i: (0, 0)),
            ],
            out_specs=pl.BlockSpec((tb, A_pad), lambda i: (i, 0)),
        ),
        compiler_params=pltpu.CompilerParams(
            dimension_semantics=("parallel",),   # shard batch grid across TCs (v7x)
            vmem_limit_bytes=vmem_limit,
        ),
        cost_estimate=pl.CostEstimate(
            flops=flops, transcendentals=0, bytes_accessed=bytes_accessed),
    )(x_in, w1_p, b1_p, w2_p, b2_p)

    return out_padded[:B, :out_actions].astype(jnp.float32)


def init_params(key, in_features, hidden, out_actions):
    """Deterministic synthetic init (Kaiming-ish uniform, like nn.Linear default)."""
    k1, k2, k3, k4 = jax.random.split(key, 4)
    lim1 = 1.0 / jnp.sqrt(in_features)
    lim2 = 1.0 / jnp.sqrt(hidden)
    w1 = jax.random.uniform(k1, (in_features, hidden), jnp.float32, -lim1, lim1)
    b1 = jax.random.uniform(k2, (1, hidden), jnp.float32, -lim1, lim1)
    w2 = jax.random.uniform(k3, (hidden, out_actions), jnp.float32, -lim2, lim2)
    b2 = jax.random.uniform(k4, (1, out_actions), jnp.float32, -lim2, lim2)
    return w1, b1, w2, b2


if __name__ == "__main__":
    # collector.state_shape = (4, 16, 16), collector.out_action = 8
    B, C, H, W = 2, 4, 16, 16
    HIDDEN = 32
    OUT_ACTIONS = 8

    key = jax.random.PRNGKey(0)
    k_obs, k_par = jax.random.split(key)

    obs = jax.random.normal(k_obs, (B, C, H, W), jnp.float32)
    w1, b1, w2, b2 = init_params(k_par, C * H * W, HIDDEN, OUT_ACTIONS)

    # Parameter padding/cast done once at init (hoisted out of the hot path).
    w1_p, b1_p, w2_p, b2_p = prepare_params(w1, b1, w2, b2)

    logits = policy_forward(obs, w1_p, b1_p, w2_p, b2_p, out_actions=OUT_ACTIONS)
    logits = jax.block_until_ready(logits)

    # Reference mirroring the kernel's mixed-precision numerics
    # (bf16 inputs, f32 accumulation, bf16 output rounding).
    x = obs.reshape(B, -1)
    xb = x.astype(jnp.bfloat16)
    h_ref = jnp.dot(xb, w1.astype(jnp.bfloat16),
                    preferred_element_type=jnp.float32) + b1
    h_ref = jnp.maximum(h_ref, 0.0).astype(jnp.bfloat16)
    ref = jnp.dot(h_ref, w2.astype(jnp.bfloat16),
                  preferred_element_type=jnp.float32) + b2
    ref = ref.astype(jnp.bfloat16).astype(jnp.float32)

    assert logits.shape == (B, OUT_ACTIONS)
    assert jnp.allclose(logits, ref, atol=1e-2, rtol=1e-2)

    # Sanity-check against the full-f32 reference (looser, bf16 rounding).
    ref_f32 = jnp.maximum(x @ w1 + b1, 0.0) @ w2 + b2
    assert jnp.allclose(logits, ref_f32, atol=5e-2, rtol=5e-2)

    print("KERNEL_OK")
</pallas_src>

<mosaic_0001>
module attributes {stable_mosaic.version = 11 : i64} {
  func.func @policy_mlp_kernel(%arg0: i32, %arg1: memref<8x1024xf32, #tpu.memory_space<vmem>>, %arg2: memref<1024x128xbf16, #tpu.memory_space<vmem>>, %arg3: memref<1x128xf32, #tpu.memory_space<vmem>>, %arg4: memref<128x128xbf16, #tpu.memory_space<vmem>>, %arg5: memref<1x128xf32, #tpu.memory_space<vmem>>, %arg6: memref<8x128xbf16, #tpu.memory_space<vmem>>) attributes {dimension_semantics = [#tpu.dimension_semantics<parallel>], iteration_bounds = array<i64: 1>, scalar_prefetch = 0 : i64, scratch_operands = 0 : i64, tpu.core_type = #tpu.core_type<tc>, window_params = [{transform_indices = @transform_0, window_bounds = array<i64: 8, 1024>}, {pipeline_mode = #tpu.pipeline_mode<synchronous>, transform_indices = @transform_1, window_bounds = array<i64: 1024, 128>}, {pipeline_mode = #tpu.pipeline_mode<synchronous>, transform_indices = @transform_2, window_bounds = array<i64: 1, 128>}, {pipeline_mode = #tpu.pipeline_mode<synchronous>, transform_indices = @transform_3, window_bounds = array<i64: 128, 128>}, {pipeline_mode = #tpu.pipeline_mode<synchronous>, transform_indices = @transform_4, window_bounds = array<i64: 1, 128>}, {transform_indices = @transform_5, window_bounds = array<i64: 8, 128>}]} {
    %c0 = arith.constant 0 : index
    %c0_0 = arith.constant 0 : index
    %0 = vector.load %arg1[%c0, %c0_0] : memref<8x1024xf32, #tpu.memory_space<vmem>>, vector<8x1024xf32>
    %1 = arith.truncf %0 : vector<8x1024xf32> to vector<8x1024xbf16>
    %c0_1 = arith.constant 0 : index
    %c0_2 = arith.constant 0 : index
    %2 = vector.load %arg2[%c0_1, %c0_2] : memref<1024x128xbf16, #tpu.memory_space<vmem>>, vector<1024x128xbf16>
    %cst = arith.constant dense<0.000000e+00> : vector<8x128xf32>
    %3 = tpu.matmul %1, %2, %cst {dimension_numbers = #tpu.dot_dimension_numbers<[1], [0], [0], [1], [0, 0, 1, 1], [], []>} : vector<8x1024xbf16>, vector<1024x128xbf16>, vector<8x128xf32> -> vector<8x128xf32>
    %c0_3 = arith.constant 0 : index
    %c0_4 = arith.constant 0 : index
    %4 = vector.load %arg3[%c0_3, %c0_4] : memref<1x128xf32, #tpu.memory_space<vmem>>, vector<1x128xf32>
    %5 = vector.broadcast %4 : vector<1x128xf32> to vector<8x128xf32>
    %6 = arith.addf %3, %5 : vector<8x128xf32>
    %cst_5 = arith.constant 0.000000e+00 : f32
    %7 = vector.broadcast %cst_5 : f32 to vector<8x128xf32>
    %8 = arith.maximumf %6, %7 : vector<8x128xf32>
    %9 = arith.truncf %8 : vector<8x128xf32> to vector<8x128xbf16>
    %c0_6 = arith.constant 0 : index
    %c0_7 = arith.constant 0 : index
    %10 = vector.load %arg4[%c0_6, %c0_7] : memref<128x128xbf16, #tpu.memory_space<vmem>>, vector<128x128xbf16>
    %cst_8 = arith.constant dense<0.000000e+00> : vector<8x128xf32>
    %11 = tpu.matmul %9, %10, %cst_8 {dimension_numbers = #tpu.dot_dimension_numbers<[1], [0], [0], [1], [0, 0, 1, 1], [], []>} : vector<8x128xbf16>, vector<128x128xbf16>, vector<8x128xf32> -> vector<8x128xf32>
    %c0_9 = arith.constant 0 : index
    %c0_10 = arith.constant 0 : index
    %12 = vector.load %arg5[%c0_9, %c0_10] : memref<1x128xf32, #tpu.memory_space<vmem>>, vector<1x128xf32>
    %13 = vector.broadcast %12 : vector<1x128xf32> to vector<8x128xf32>
    %14 = arith.addf %11, %13 : vector<8x128xf32>
    %15 = arith.truncf %14 : vector<8x128xf32> to vector<8x128xbf16>
    %c0_11 = arith.constant 0 : index
    %c0_12 = arith.constant 0 : index
    %16 = vector.load %arg6[%c0_11, %c0_12] : memref<8x128xbf16, #tpu.memory_space<vmem>>, vector<8x128xbf16>
    tpu.vector_store %arg6[%c0_11, %c0_12], %15 {strides = array<i32>} : memref<8x128xbf16, #tpu.memory_space<vmem>>, vector<8x128xbf16>,
    return
  }
  func.func @transform_0(%arg0: i32) -> (i32, i32) {
    %c0_i32 = arith.constant 0 : i32
    %c0_i32_0 = arith.constant 0 : i32
    return %arg0, %c0_i32 : i32, i32
  }
  func.func @transform_1(%arg0: i32) -> (i32, i32) {
    %c0_i32 = arith.constant 0 : i32
    %c0_i32_0 = arith.constant 0 : i32
    %c0_i32_1 = arith.constant 0 : i32
    return %c0_i32, %c0_i32_0 : i32, i32
  }
  func.func @transform_2(%arg0: i32) -> (i32, i32) {
    %c0_i32 = arith.constant 0 : i32
    %c0_i32_0 = arith.constant 0 : i32
    %c0_i32_1 = arith.constant 0 : i32
    return %c0_i32, %c0_i32_0 : i32, i32
  }
  func.func @transform_3(%arg0: i32) -> (i32, i32) {
    %c0_i32 = arith.constant 0 : i32
    %c0_i32_0 = arith.constant 0 : i32
    %c0_i32_1 = arith.constant 0 : i32
    return %c0_i32, %c0_i32_0 : i32, i32
  }
  func.func @transform_4(%arg0: i32) -> (i32, i32) {
    %c0_i32 = arith.constant 0 : i32
    %c0_i32_0 = arith.constant 0 : i32
    %c0_i32_1 = arith.constant 0 : i32
    return %c0_i32, %c0_i32_0 : i32, i32
  }
  func.func @transform_5(%arg0: i32) -> (i32, i32) {
    %c0_i32 = arith.constant 0 : i32
    %c0_i32_0 = arith.constant 0 : i32
    return %arg0, %c0_i32 : i32, i32
  }
}

</mosaic_0001>

<bundles_post_ra>
// kernel: policy_forward.1
= control target key start
LH: loop header
LB: loop body
LE: loop exit
PB: predicated region body
PF: predicated region fallthrough
CT: control target
= control target key end

     0   :  { %10 = vsyncpa [#allocation3], 0  ;;  %s1153_s21 = smov [#allocation2]   ;;  %s1154_s23 = smov 64   ;;  %s1246_s0 = inlined_call_operand.vmem [shape: f32[8,1024], index: 0, kind: input, shape index: {}]   ;;  %s1247_s1 = inlined_call_operand.hbm [shape: bf16[1024,128], index: 1, kind: input, shape index: {}]   ;;  %s1248_s2 = inlined_call_operand.vmem [shape: f32[1,128], index: 2, kind: input, shape index: {}]   ;;  %s1249_s3 = inlined_call_operand.vmem [shape: bf16[128,128], index: 3, kind: input, shape index: {}]   ;;  %s1250_s4 = inlined_call_operand.vmem [shape: f32[1,128], index: 4, kind: input, shape index: {}]   ;;  %s1251_s5 = inlined_call_operand.vmem [shape: bf16[8,128], index: 5, kind: output, shape index: {}]  }
   0x1   :  { %s17_s20 = sshll.u32 %s1247_s1, 4  ;;  %s19_s22 = sshll.u32 %s1153_s21, 4  ;;  %s18_s20 = int_to_ptr.hbm [resolvable:$true] %s17_s20  ;;  %s20_s22 = int_to_ptr.vmem [resolvable:$true] %s19_s22 }
   0x2   :  { %s1155_s24 = smov 4  }
   0x3   :  { %25 = dma.hbm_to_vmem [thread:$0]  %s18_s20, 8192, %s20_s22, [#allocation3], %s1154_s23, %s1154_s23, %s1155_s24  }
   0x4   :  { %1151 = dma.done.wait [#allocation3], 8192  }
   0x5   :  { %1152 = vsyncadd [#allocation3], 4294959104  ;;  %v1057_v0 = vld [vmem:[#allocation2 + $0x38] sm:$0xff]  ;;  %v1056_v4 = vld [vmem:[#allocation2 + $0x30] sm:$0xff] }
   0x6   :  { %v1065_v1 = vld [vmem:[#allocation2 + $0x78] sm:$0xff]  ;;  %568 = vmatpush.bf16.msra.mxu0 %v1057_v0  ;;  %v1064_v5 = vld [vmem:[#allocation2 + $0x70] sm:$0xff]  ;;  %v1055_v8 = vld [vmem:[#allocation2 + $0x28] sm:$0xff] }
   0x7   :  { %v1073_v2 = vld [vmem:[#allocation2 + $0xb8] sm:$0xff]  ;;  %581 = vmatpush.bf16.msra.mxu1 %v1065_v1  ;;  %v1072_v6 = vld [vmem:[#allocation2 + $0xb0] sm:$0xff]  ;;  %v1063_v9 = vld [vmem:[#allocation2 + $0x68] sm:$0xff] }
   0x8   :  { %v1081_v3 = vld [vmem:[#allocation2 + $0xf8] sm:$0xff]  ;;  %594 = vmatpush.bf16.msra.mxu2 %v1073_v2  ;;  %v1080_v7 = vld [vmem:[#allocation2 + $0xf0] sm:$0xff]  ;;  %v1071_v10 = vld [vmem:[#allocation2 + $0xa8] sm:$0xff] }
   0x9   :  { %607 = vmatpush.bf16.msra.mxu3 %v1081_v3  ;;  %v1079_v11 = vld [vmem:[#allocation2 + $0xe8] sm:$0xff]  ;;  %v1054_v12 = vld [vmem:[#allocation2 + $0x20] sm:$0xff]  ;;  %v1053_v16 = vld [vmem:[#allocation2 + $0x18] sm:$0xff] }
   0xa   :  { %569 = vmatpush.bf16.msra.mxu0 %v1056_v4  ;;  %v1062_v13 = vld [vmem:[#allocation2 + $0x60] sm:$0xff]  ;;  %v1061_v17 = vld [vmem:[#allocation2 + $0x58] sm:$0xff]  ;;  %v1052_v20 = vld [vmem:[#allocation2 + $0x10] sm:$0xff] }
   0xb   :  { %582 = vmatpush.bf16.msra.mxu1 %v1064_v5  ;;  %v1070_v14 = vld [vmem:[#allocation2 + $0xa0] sm:$0xff]  ;;  %v1069_v18 = vld [vmem:[#allocation2 + $0x98] sm:$0xff]  ;;  %v1060_v21 = vld [vmem:[#allocation2 + $0x50] sm:$0xff] }
   0xc   :  { %595 = vmatpush.bf16.msra.mxu2 %v1072_v6  ;;  %v1078_v15 = vld [vmem:[#allocation2 + $0xe0] sm:$0xff]  ;;  %v1077_v19 = vld [vmem:[#allocation2 + $0xd8] sm:$0xff]  ;;  %v1068_v22 = vld [vmem:[#allocation2 + $0x90] sm:$0xff] }
   0xd   :  { %608 = vmatpush.bf16.msra.mxu3 %v1080_v7  ;;  %v1076_v23 = vld [vmem:[#allocation2 + $0xd0] sm:$0xff]  ;;  %v1051_v24 = vld [vmem:[#allocation2 + $0x8] sm:$0xff]  ;;  %v1050_v28 = vld [vmem:[#allocation2] sm:$0xff] }
   0xe   :  { %570 = vmatpush.bf16.msra.mxu0 %v1055_v8  ;;  %v1059_v25 = vld [vmem:[#allocation2 + $0x48] sm:$0xff]  ;;  %v1058_v29 = vld [vmem:[#allocation2 + $0x40] sm:$0xff]  ;;  %v1089_v32 = vld [vmem:[#allocation2 + $0x138] sm:$0xff] }
   0xf   :  { %583 = vmatpush.bf16.msra.mxu1 %v1063_v9  ;;  %v1067_v26 = vld [vmem:[#allocation2 + $0x88] sm:$0xff]  ;;  %v1066_v30 = vld [vmem:[#allocation2 + $0x80] sm:$0xff]  ;;  %v38_v33 = vld [vmem:[%s1246_s0 + $0x10] sm:$0xff] }
  0x10   :  { %596 = vmatpush.bf16.msra.mxu2 %v1071_v10  ;;  %v1075_v27 = vld [vmem:[#allocation2 + $0xc8] sm:$0xff]  ;;  %v1074_v31 = vld [vmem:[#allocation2 + $0xc0] sm:$0xff]  ;;  %v1097_v35 = vld [vmem:[#allocation2 + $0x178] sm:$0xff]  ;;  %v46_v40 = vpack.c.bf16 %v38_v33, %v38_v33 }
  0x11   :  { %609 = vmatpush.bf16.msra.mxu3 %v1079_v11  ;;  %v36_v34 = vld [vmem:[%s1246_s0] sm:$0xff]  ;;  %v39_v36 = vld [vmem:[%s1246_s0 + $0x18] sm:$0xff]  ;;  %v37_v37 = vld [vmem:[%s1246_s0 + $0x8] sm:$0xff] }
  0x12   :  { %571 = vmatpush.bf16.msra.mxu0 %v1054_v12  ;;  %v1105_v38 = vld [vmem:[#allocation2 + $0x1b8] sm:$0xff]  ;;  %v44_v41 = vpack.c.bf16 %v36_v34, %v36_v34  ;;  %v47_v42 = vpack.c.bf16 %v39_v36, %v39_v36  ;;  %v45_v43 = vpack.c.bf16 %v37_v37, %v37_v37  ;;  %v1088_v44 = vld [vmem:[#allocation2 + $0x130] sm:$0xff]  ;;  %v1087_v48 = vld [vmem:[#allocation2 + $0x128] sm:$0xff] }
  0x13   :  { %584 = vmatpush.bf16.msra.mxu1 %v1062_v13  ;;  %v1113_v39 = vld [vmem:[#allocation2 + $0x1f8] sm:$0xff]  ;;  %v1096_v45 = vld [vmem:[#allocation2 + $0x170] sm:$0xff]  ;;  %v1095_v49 = vld [vmem:[#allocation2 + $0x168] sm:$0xff] }
  0x14   :  { %597 = vmatpush.bf16.msra.mxu2 %v1070_v14  ;;  %v1104_v46 = vld [vmem:[#allocation2 + $0x1b0] sm:$0xff]  ;;  %v1103_v50 = vld [vmem:[#allocation2 + $0x1a8] sm:$0xff]  ;;  %v1086_v52 = vld [vmem:[#allocation2 + $0x120] sm:$0xff] }
  0x15   :  { %610 = vmatpush.bf16.msra.mxu3 %v1078_v15  ;;  %v1112_v47 = vld [vmem:[#allocation2 + $0x1f0] sm:$0xff]  ;;  %v1111_v51 = vld [vmem:[#allocation2 + $0x1e8] sm:$0xff]  ;;  %v1094_v53 = vld [vmem:[#allocation2 + $0x160] sm:$0xff] }
  0x16   :  { %572 = vmatpush.bf16.msra.mxu0 %v1053_v16  ;;  %v1102_v54 = vld [vmem:[#allocation2 + $0x1a0] sm:$0xff]  ;;  %v1085_v56 = vld [vmem:[#allocation2 + $0x118] sm:$0xff]  ;;  %v1084_v60 = vld [vmem:[#allocation2 + $0x110] sm:$0xff] }
  0x17   :  { %585 = vmatpush.bf16.msra.mxu1 %v1061_v17  ;;  %v1110_v55 = vld [vmem:[#allocation2 + $0x1e0] sm:$0xff]  ;;  %v1093_v57 = vld [vmem:[#allocation2 + $0x158] sm:$0xff]  ;;  %v1092_v61 = vld [vmem:[#allocation2 + $0x150] sm:$0xff] }
  0x18   :  { %598 = vmatpush.bf16.msra.mxu2 %v1069_v18  ;;  %v1101_v58 = vld [vmem:[#allocation2 + $0x198] sm:$0xff]  ;;  %v1100_v62 = vld [vmem:[#allocation2 + $0x190] sm:$0xff]  ;;  %v1083_v0 = vld [vmem:[#allocation2 + $0x108] sm:$0xff] }
  0x19   :  { %611 = vmatpush.bf16.msra.mxu3 %v1077_v19  ;;  %v1109_v59 = vld [vmem:[#allocation2 + $0x1d8] sm:$0xff]  ;;  %v1108_v63 = vld [vmem:[#allocation2 + $0x1d0] sm:$0xff]  ;;  %v1091_v1 = vld [vmem:[#allocation2 + $0x148] sm:$0xff] }
  0x1a   :  { %573 = vmatpush.bf16.msra.mxu0 %v1052_v20  ;;  %v1099_v2 = vld [vmem:[#allocation2 + $0x188] sm:$0xff]  ;;  %v1082_v4 = vld [vmem:[#allocation2 + $0x100] sm:$0xff]  ;;  %v42_v10 = vld [vmem:[%s1246_s0 + $0x30] sm:$0xff] }
  0x1b   :  { %586 = vmatpush.bf16.msra.mxu1 %v1060_v21  ;;  %v1107_v3 = vld [vmem:[#allocation2 + $0x1c8] sm:$0xff]  ;;  %v1090_v5 = vld [vmem:[#allocation2 + $0x140] sm:$0xff]  ;;  %v43_v11 = vld [vmem:[%s1246_s0 + $0x38] sm:$0xff]  ;;  %v50_v14 = vpack.c.bf16 %v42_v10, %v42_v10 }
  0x1c   :  { %599 = vmatpush.bf16.msra.mxu2 %v1068_v22  ;;  %v1098_v6 = vld [vmem:[#allocation2 + $0x180] sm:$0xff]  ;;  %v41_v8 = vld [vmem:[%s1246_s0 + $0x28] sm:$0xff]  ;;  %v51_v15 = vpack.c.bf16 %v43_v11, %v43_v11  ;;  %v1121_v16 = vld [vmem:[%s1249_s3 + $0x38] sm:$0xff] }
  0x1d   :  { %612 = vmatpush.bf16.msra.mxu3 %v1076_v23  ;;  %v40_v7 = vld [vmem:[%s1246_s0 + $0x20] sm:$0xff]  ;;  %v49_v13 = vpack.c.bf16 %v41_v8, %v41_v8  ;;  %v1120_v17 = vld [vmem:[%s1249_s3 + $0x30] sm:$0xff]  ;;  %v1119_v18 = vld [vmem:[%s1249_s3 + $0x28] sm:$0xff] }
  0x1e   :  { %574 = vmatpush.bf16.msra.mxu0 %v1051_v24  ;;  %v1106_v9 = vld [vmem:[#allocation2 + $0x1c0] sm:$0xff]  ;;  %v48_v12 = vpack.c.bf16 %v40_v7, %v40_v7  ;;  %v1117_v20 = vld [vmem:[%s1249_s3 + $0x18] sm:$0xff]  ;;  %v1116_v22 = vld [vmem:[%s1249_s3 + $0x10] sm:$0xff] }
  0x1f   :  { %587 = vmatpush.bf16.msra.mxu1 %v1059_v25  ;;  %v1118_v19 = vld [vmem:[%s1249_s3 + $0x20] sm:$0xff]  ;;  %v1115_v24 = vld [vmem:[%s1249_s3 + $0x8] sm:$0xff] }
  0x20   :  { %600 = vmatpush.bf16.msra.mxu2 %v1067_v26 }
  0x21   :  { %613 = vmatpush.bf16.msra.mxu3 %v1075_v27 }
  0x22   :  { %575 = vmatpush.bf16.msra.mxu0 %v1050_v28  ;;  %v1114_v28 = vld [vmem:[%s1249_s3] sm:$0xff] }
  0x23   :  { %588 = vmatpush.bf16.msra.mxu1 %v1058_v29 }
  0x24   :  { %601 = vmatpush.bf16.msra.mxu2 %v1066_v30  ;;  %v1125_v30 = vld [vmem:[%s1248_s2] ss:$0 sm:$0xff] }
  0x25   :  { %614 = vmatpush.bf16.msra.mxu3 %v1074_v31  ;;  %576 = vmatmul.bf16.vlgmr.msra.gmra.mxu0 %v44_v41 }
  0x26   :  { %620 = vmatpush.bf16.msrb.mxu0 %v1089_v32  ;;  %589 = vmatmul.bf16.vlgmr.msra.gmra.mxu1 %v45_v43 }
  0x27   :  { %633 = vmatpush.bf16.msrb.mxu1 %v1097_v35  ;;  %602 = vmatmul.bf16.vlgmr.msra.gmra.mxu2 %v46_v40 }
  0x28   :  { %646 = vmatpush.bf16.msrb.mxu2 %v1105_v38  ;;  %615 = vmatmul.bf16.vlgmr.msra.gmra.mxu3 %v47_v42 }
  0x29   :  { %659 = vmatpush.bf16.msrb.mxu3 %v1113_v39 }
  0x2a   :  { %621 = vmatpush.bf16.msrb.mxu0 %v1088_v44 }
  0x2b   :  { %634 = vmatpush.bf16.msrb.mxu1 %v1096_v45 }
  0x2c   :  { %647 = vmatpush.bf16.msrb.mxu2 %v1104_v46 }
  0x2d   :  { %660 = vmatpush.bf16.msrb.mxu3 %v1112_v47 }
  0x2e   :  { %622 = vmatpush.bf16.msrb.mxu0 %v1087_v48 }
  0x2f   :  { %635 = vmatpush.bf16.msrb.mxu1 %v1095_v49 }
  0x30   :  { %648 = vmatpush.bf16.msrb.mxu2 %v1103_v50 }
  0x31   :  { %661 = vmatpush.bf16.msrb.mxu3 %v1111_v51  ;;  %v1126_v51 = vld [vmem:[%s1250_s4] ss:$0 sm:$0xff] }
  0x32   :  { %623 = vmatpush.bf16.msrb.mxu0 %v1086_v52 }
  0x33   :  { %636 = vmatpush.bf16.msrb.mxu1 %v1094_v53 }
  0x34   :  { %649 = vmatpush.bf16.msrb.mxu2 %v1102_v54 }
  0x35   :  { %662 = vmatpush.bf16.msrb.mxu3 %v1110_v55 }
  0x36   :  { %624 = vmatpush.bf16.msrb.mxu0 %v1085_v56 }
  0x37   :  { %637 = vmatpush.bf16.msrb.mxu1 %v1093_v57 }
  0x38   :  { %650 = vmatpush.bf16.msrb.mxu2 %v1101_v58 }
  0x39   :  { %663 = vmatpush.bf16.msrb.mxu3 %v1109_v59 }
  0x3a   :  { %625 = vmatpush.bf16.msrb.mxu0 %v1084_v60 }
  0x3b   :  { %638 = vmatpush.bf16.msrb.mxu1 %v1092_v61 }
  0x3c   :  { %651 = vmatpush.bf16.msrb.mxu2 %v1100_v62 }
  0x3d   :  { %664 = vmatpush.bf16.msrb.mxu3 %v1108_v63 }
  0x3e   :  { %626 = vmatpush.bf16.msrb.mxu0 %v1083_v0 }
  0x3f   :  { %639 = vmatpush.bf16.msrb.mxu1 %v1091_v1 }
  0x40   :  { %652 = vmatpush.bf16.msrb.mxu2 %v1099_v2 }
  0x41   :  { %665 = vmatpush.bf16.msrb.mxu3 %v1107_v3 }
  0x42   :  { %627 = vmatpush.bf16.msrb.mxu0 %v1082_v4 }
  0x43   :  { %640 = vmatpush.bf16.msrb.mxu1 %v1090_v5 }
  0x44   :  { %653 = vmatpush.bf16.msrb.mxu2 %v1098_v6 }
  0x45   :  { %666 = vmatpush.bf16.msrb.mxu3 %v1106_v9  ;;  %628 = vmatmul.bf16.vlgmr.msrb.gmra.mxu0 %v48_v12 }
  0x46   :  { %641 = vmatmul.bf16.vlgmr.msrb.gmra.mxu1 %v49_v13  ;;  %742 = vmatpush.bf16.msra.mxu0 %v1121_v16 }
  0x47   :  { %654 = vmatmul.bf16.vlgmr.msrb.gmra.mxu2 %v50_v14 }
  0x48   :  { %667 = vmatmul.bf16.vlgmr.msrb.gmra.mxu3 %v51_v15 }
  0x4a   :  { %743 = vmatpush.bf16.msra.mxu0 %v1120_v17 }
  0x4e   :  { %744 = vmatpush.bf16.msra.mxu0 %v1119_v18 }
  0x52   :  { %745 = vmatpush.bf16.msra.mxu0 %v1118_v19 }
  0x56   :  { %746 = vmatpush.bf16.msra.mxu0 %v1117_v20 }
  0x5a   :  { %747 = vmatpush.bf16.msra.mxu0 %v1116_v22 }
  0x5e   :  { %748 = vmatpush.bf16.msra.mxu0 %v1115_v24 }
  0x62   :  { %749 = vmatpush.bf16.msra.mxu0 %v1114_v28 }
  0xa2   :  { %v577_v21 = vpop.f32.mrf.mxu0 }
  0xa3   :  { %v590_v23 = vpop.f32.mrf.mxu1  ;;  %v578_v33 = vadd.f32 %v1125_v30, %v577_v21 }
  0xa5   :  { %v591_v34 = vadd.f32 %v590_v23, %v578_v33 }
  0xaa   :  { %v603_v25 = vpop.f32.mrf.mxu2  ;;  %v579_v27 = vpop.f32.mrf.mxu0 }
  0xab   :  { %v616_v26 = vpop.f32.mrf.mxu3  ;;  %v592_v29 = vpop.f32.mrf.mxu1  ;;  %v604_v35 = vadd.f32 %v603_v25, %v591_v34 }
  0xad   :  { %v617_v36 = vadd.f32 %v616_v26, %v604_v35 }
  0xb2   :  { %v605_v31 = vpop.f32.mrf.mxu2 }
  0xb3   :  { %v618_v32 = vpop.f32.mrf.mxu3 }
  0xc2   :  { %v629_v37 = vpop.f32.mrf.mxu0 }
  0xc3   :  { %v642_v38 = vpop.f32.mrf.mxu1  ;;  %v630_v39 = vadd.f32 %v629_v37, %v617_v36 }
  0xc5   :  { %v643_v40 = vadd.f32 %v642_v38, %v630_v39 }
  0xca   :  { %v655_v41 = vpop.f32.mrf.mxu2  ;;  %v631_v44 = vpop.f32.mrf.mxu0 }
  0xcb   :  { %v668_v42 = vpop.f32.mrf.mxu3  ;;  %v656_v43 = vadd.f32 %v655_v41, %v643_v40  ;;  %v644_v45 = vpop.f32.mrf.mxu1 }
  0xcd   :  { %v669_v46 = vadd.f32 %v668_v42, %v656_v43 }
  0xcf   :  { %v672_v47 = vmax.f32 %v669_v46, 0.0 }
  0xd1   :  { %v673_v48 = vpack.c.bf16 %v672_v47, %v672_v47 }
  0xd2   :  { %v657_v49 = vpop.f32.mrf.mxu2 }
  0xd3   :  { %v670_v50 = vpop.f32.mrf.mxu3  ;;  %750 = vmatmul.bf16.vlgmr.msra.gmra.mxu0 %v673_v48 }
 0x150   :  { %v751_v52 = vpop.f32.mrf.mxu0 }
 0x151   :  { %v752_v53 = vadd.f32 %v1126_v51, %v751_v52 }
 0x153   :  { %v755_v54 = vpack.c.bf16 %v752_v53, %v752_v53 }
 0x155   :  { %756 = vst [vmem:[%s1251_s5] sm:$0xf] %v755_v54 }
 0x158   :  { %v753_v55 = vpop.f32.mrf.mxu0 }
 0x159   :  { %761 = vsyncpa [#allocation3], 1 }

</bundles_post_ra>
